<compile_context>
chip_gen: v6e
topology: v6e:2x2x1
jax: 0.10.0
libtpu: 0.0.40
codegen_flags: <defaults>
</compile_context>

<pallas_src>
import itertools
import math

import numpy as np
import jax
import jax.numpy as jnp
from jax.experimental import pallas as pl
from jax.experimental.pallas import tpu as pltpu


def _round_up(v, m):
    return (v + m - 1) // m * m


def make_trn_kernel(S, B, RP):
    """Kernel body; grid=(S,) iterates scales.  Rows of each per-scale slab are r-major
    (row = r * B + b); unused relation slots are zeroed by the validity mask."""

    def kernel(x_ref, mask_ref, w1_ref, b1_ref, w2_ref, b2_ref,
               wcf_ref, bct_ref, out_ref, hsum_ref):
        s = pl.program_id(0)

        # fc_fusion: ReLU -> Linear -> ReLU -> [Dropout] -> Linear -> ReLU -> [Dropout]
        # TODO(synk): Dropout(p=0.6) is identity at inference; training-mode RNG dropout
        # (pltpu.prng_*) is not emulated.
        x = jnp.maximum(x_ref[0], 0)                                       # (MP, SDP) bf16
        h1 = jnp.dot(x, w1_ref[0], preferred_element_type=jnp.float32) + b1_ref[0]
        h1 = jnp.maximum(h1, 0.0).astype(jnp.bfloat16)                     # (MP, NB)
        h2 = jnp.dot(h1, w2_ref[0], preferred_element_type=jnp.float32) + b2_ref[0]
        h2 = jnp.maximum(h2, 0.0) * mask_ref[0]                            # zero padded rows

        # Sum the (<= RP) relation rows belonging to each batch element (VPU slice-add,
        # replaces the old O(B^2) selection matmul).
        hsum = h2[0:B, :]
        for r in range(1, RP):
            hsum = hsum + h2[r * B:(r + 1) * B, :]                         # (B, NB) f32
        hsum_ref[s] = hsum

        # Final step: fused classifier over all scales — one (B, S*NB) @ (S*NB, NCP)
        # matmul; all per-scale classifier biases were pre-folded into bct.
        @pl.when(s == S - 1)
        def _():
            hcat = jnp.concatenate([hsum_ref[i] for i in range(S)], axis=-1)
            logits = jnp.dot(hcat.astype(jnp.bfloat16), wcf_ref[...],
                             preferred_element_type=jnp.float32)
            out_ref[...] = (logits + bct_ref[...]).astype(out_ref.dtype)

    return kernel


def prepare_trn_params(params, n_rels, B, T, D, num_class):
    """One-time packing of the static per-scale weights (hoisted out of the per-call
    path).  params[s] = (w1 (scale*D, NB), b1 (NB,), w2 (NB, NB), b2 (NB,),
    wc (NB, NC), bc (NC,)) with Linear weights stored as (in, out)."""
    S = len(params)
    NB = params[0][0].shape[1]
    NC = num_class
    SDP = _round_up(T * D, 128)                          # lane-aligned fc_fusion input width
    NCP = _round_up(NC, 128)                             # lane-dense classifier output width
    RP = _round_up(max(n_rels), 8 // math.gcd(B, 8))     # relation slots: RP*B % 8 == 0
    MP = RP * B

    w1a = np.zeros((S, SDP, NB), np.float32)
    b1a = np.zeros((S, 1, NB), np.float32)
    w2a = np.zeros((S, NB, NB), np.float32)
    b2a = np.zeros((S, 1, NB), np.float32)
    wcf = np.zeros((S * NB, NCP), np.float32)
    bct = np.zeros((1, NCP), np.float32)
    mask = np.zeros((S, MP, 1), np.float32)

    for s, (w1, b1, w2, b2, wc, bc) in enumerate(params):
        sd = w1.shape[0]                                 # scale_s * D
        w1a[s, :sd, :] = np.asarray(w1, np.float32)
        b1a[s, 0, :] = np.asarray(b1, np.float32)
        w2a[s] = np.asarray(w2, np.float32)
        b2a[s, 0, :] = np.asarray(b2, np.float32)
        wcf[s * NB:(s + 1) * NB, :NC] = np.asarray(wc, np.float32)
        bct[0, :NC] += n_rels[s] * np.asarray(bc, np.float32)
        mask[s, :n_rels[s] * B, 0] = 1.0

    return dict(
        S=S, B=B, NB=NB, NC=NC, SDP=SDP, NCP=NCP, RP=RP, MP=MP,
        w1a=jnp.asarray(w1a, jnp.bfloat16),
        b1a=jnp.asarray(b1a),
        w2a=jnp.asarray(w2a, jnp.bfloat16),
        b2a=jnp.asarray(b2a),
        wcf=jnp.asarray(wcf, jnp.bfloat16),
        bct=jnp.asarray(bct),
        mask=jnp.asarray(mask),
    )


def trn_forward(x, selected_rels, packed):
    """x: (B, T, D).  selected_rels: per-scale list of frame-index tuples (the sampled
    relations).  Returns (B, NC)."""
    B, T, D = x.shape
    S, RP, MP, SDP = packed["S"], packed["RP"], packed["MP"], packed["SDP"]
    NB, NCP, NC = packed["NB"], packed["NCP"], packed["NC"]

    # Per-call work: gather sampled relation rows of x into a zero-padded bf16 slab per
    # scale, rows r-major (row = r * B + b) to match the in-kernel slice-sum.
    # TODO(synk): at production sizes pass frame indices via PrefetchScalarGridSpec and
    # gather inside the kernel instead of duplicating frames into this (S, MP, SDP) slab.
    slabs = []
    for rels in selected_rels:
        rel_idx = np.asarray(rels, np.int32)                          # (n_rel, scale)
        n_rel, scale = rel_idx.shape
        xg = x[:, jnp.asarray(rel_idx), :]                            # (B, n_rel, scale, D)
        xg = jnp.transpose(xg, (1, 0, 2, 3)).reshape(n_rel * B, scale * D)
        slab = jnp.zeros((MP, SDP), jnp.float32).at[:n_rel * B, :scale * D].set(xg)
        slabs.append(slab)
    x_all = jnp.stack(slabs).astype(jnp.bfloat16)                     # (S, MP, SDP)

    grid_spec = pltpu.PrefetchScalarGridSpec(
        num_scalar_prefetch=0,
        grid=(S,),
        in_specs=[
            pl.BlockSpec((1, MP, SDP), lambda s: (s, 0, 0)),    # x slab (per scale)
            pl.BlockSpec((1, MP, 1),   lambda s: (s, 0, 0)),    # validity mask
            pl.BlockSpec((1, SDP, NB), lambda s: (s, 0, 0)),    # fc_fusion Linear #1 W
            pl.BlockSpec((1, 1, NB),   lambda s: (s, 0, 0)),    # fc_fusion Linear #1 b
            pl.BlockSpec((1, NB, NB),  lambda s: (s, 0, 0)),    # fc_fusion Linear #2 W
            pl.BlockSpec((1, 1, NB),   lambda s: (s, 0, 0)),    # fc_fusion Linear #2 b
            pl.BlockSpec((S * NB, NCP), lambda s: (0, 0)),      # stacked classifier W (resident)
            pl.BlockSpec((1, NCP),      lambda s: (0, 0)),      # folded classifier biases
        ],
        out_specs=pl.BlockSpec((B, NCP), lambda s: (0, 0)),     # resident, written at last step
        scratch_shapes=[pltpu.VMEM((S, B, NB), jnp.float32)],   # per-scale relation sums
    )

    out = pl.pallas_call(
        make_trn_kernel(S, B, RP),
        out_shape=jax.ShapeDtypeStruct((B, NCP), jnp.float32),
        grid_spec=grid_spec,
        compiler_params=pltpu.CompilerParams(
            # Scale axis is a sequential reduction into scratch -> "arbitrary".
            # TODO(synk): at production sizes tile relation*batch rows to M=128/256 as an
            # extra "parallel" grid axis (megacore) and K-tile w1 if SDP grows large.
            dimension_semantics=("arbitrary",),
            vmem_limit_bytes=32 * 1024 * 1024,
        ),
    )(x_all, packed["mask"], packed["w1a"], packed["b1a"],
      packed["w2a"], packed["b2a"], packed["wcf"], packed["bct"])
    return out[:, :NC]


def ref_forward(x, selected_rels, params):
    """Pure-JAX f32 reference matching the PyTorch multi-scale forward (eval-mode dropout)."""
    B = x.shape[0]
    acc = None
    for s, rels in enumerate(selected_rels):
        w1, b1, w2, b2, wc, bc = params[s]
        for rel in rels:
            xr = x[:, jnp.asarray(rel, dtype=jnp.int32), :].reshape(B, -1)
            h = jnp.maximum(xr, 0.0)
            h = jnp.maximum(h @ w1 + b1, 0.0)
            h = jnp.maximum(h @ w2 + b2, 0.0)
            logit = h @ wc + bc
            acc = logit if acc is None else acc + logit
    return acc


if __name__ == "__main__":
    # Small shapes consistent with the module.
    B = 2
    num_frames = 8           # T
    img_feature_dim = 32     # D
    num_class = 16
    num_bottleneck = 256     # fixed by the module
    subsample_num = 3

    scales = list(range(num_frames, 1, -1))                          # [8,7,...,2]
    relations_scales = [list(itertools.combinations(range(num_frames), sc)) for sc in scales]
    subsample_scales = [min(subsample_num, len(r)) for r in relations_scales]

    # Deterministic stand-in for np.random.choice in the PyTorch forward.
    rng = np.random.RandomState(0)
    selected_rels = [[relations_scales[0][0]]]                       # scale 0: single full relation
    for s in range(1, len(scales)):
        idx = rng.choice(len(relations_scales[s]), subsample_scales[s], replace=False)
        selected_rels.append([relations_scales[s][int(i)] for i in idx])
    n_rels = [len(r) for r in selected_rels]

    # Deterministic synthetic parameters (Linear weights stored as (in, out)).
    key = jax.random.PRNGKey(0)
    key, kx = jax.random.split(key)
    x = jax.random.normal(kx, (B, num_frames, img_feature_dim), jnp.float32)

    params = []
    for sc in scales:
        key, k1, k2, k3, k4, k5, k6 = jax.random.split(key, 7)
        sd = sc * img_feature_dim
        w1 = jax.random.normal(k1, (sd, num_bottleneck), jnp.float32) * 0.05
        b1 = jax.random.normal(k2, (num_bottleneck,), jnp.float32) * 0.01
        w2 = jax.random.normal(k3, (num_bottleneck, num_bottleneck), jnp.float32) * 0.05
        b2 = jax.random.normal(k4, (num_bottleneck,), jnp.float32) * 0.01
        wc = jax.random.normal(k5, (num_bottleneck, num_class), jnp.float32) * 0.05
        bc = jax.random.normal(k6, (num_class,), jnp.float32) * 0.01
        params.append((w1, b1, w2, b2, wc, bc))

    # One-time static weight packing (hoisted out of the per-call path).
    packed = prepare_trn_params(params, n_rels, B, num_frames, img_feature_dim, num_class)

    out = trn_forward(x, selected_rels, packed)
    out = jax.block_until_ready(out)

    ref = ref_forward(x, selected_rels, params)
    assert out.shape == (B, num_class)
    # bf16 operands with f32 accumulation -> relaxed tolerance vs the f32 reference.
    np.testing.assert_allclose(np.asarray(out), np.asarray(ref), rtol=5e-2, atol=5e-2)

    print("KERNEL_OK")
</pallas_src>

<mosaic_0001>
module attributes {stable_mosaic.version = 11 : i64} {
  func.func @kernel(%arg0: i32, %arg1: memref<1x8x256xbf16, #tpu.memory_space<vmem>>, %arg2: memref<1x8x1xf32, #tpu.memory_space<vmem>>, %arg3: memref<1x256x256xbf16, #tpu.memory_space<vmem>>, %arg4: memref<1x1x256xf32, #tpu.memory_space<vmem>>, %arg5: memref<1x256x256xbf16, #tpu.memory_space<vmem>>, %arg6: memref<1x1x256xf32, #tpu.memory_space<vmem>>, %arg7: memref<1792x128xbf16, #tpu.memory_space<vmem>>, %arg8: memref<1x128xf32, #tpu.memory_space<vmem>>, %arg9: memref<2x128xf32, #tpu.memory_space<vmem>>, %arg10: memref<7x2x256xf32, #tpu.memory_space<vmem>>) attributes {dimension_semantics = [#tpu.dimension_semantics<arbitrary>], iteration_bounds = array<i64: 7>, scalar_prefetch = 0 : i64, scratch_operands = 1 : i64, tpu.core_type = #tpu.core_type<tc>, window_params = [{transform_indices = @transform_0, window_bounds = array<i64: 1, 8, 256>}, {transform_indices = @transform_1, window_bounds = array<i64: 1, 8, 1>}, {transform_indices = @transform_2, window_bounds = array<i64: 1, 256, 256>}, {transform_indices = @transform_3, window_bounds = array<i64: 1, 1, 256>}, {transform_indices = @transform_4, window_bounds = array<i64: 1, 256, 256>}, {transform_indices = @transform_5, window_bounds = array<i64: 1, 1, 256>}, {pipeline_mode = #tpu.pipeline_mode<synchronous>, transform_indices = @transform_6, window_bounds = array<i64: 1792, 128>}, {pipeline_mode = #tpu.pipeline_mode<synchronous>, transform_indices = @transform_7, window_bounds = array<i64: 1, 128>}, {pipeline_mode = #tpu.pipeline_mode<synchronous>, transform_indices = @transform_8, window_bounds = array<i64: 2, 128>}]} {
    %c0 = arith.constant 0 : index
    %c0_0 = arith.constant 0 : index
    %c0_1 = arith.constant 0 : index
    %0 = vector.load %arg1[%c0, %c0_0, %c0_1] : memref<1x8x256xbf16, #tpu.memory_space<vmem>>, vector<1x8x256xbf16>
    %1 = vector.shape_cast %0 : vector<1x8x256xbf16> to vector<8x256xbf16>
    %cst = arith.constant 0.000000e+00 : bf16
    %2 = vector.broadcast %cst : bf16 to vector<8x256xbf16>
    %3 = arith.maximumf %1, %2 : vector<8x256xbf16>
    %c0_2 = arith.constant 0 : index
    %c0_3 = arith.constant 0 : index
    %c0_4 = arith.constant 0 : index
    %4 = vector.load %arg3[%c0_2, %c0_3, %c0_4] : memref<1x256x256xbf16, #tpu.memory_space<vmem>>, vector<1x256x256xbf16>
    %5 = vector.shape_cast %4 : vector<1x256x256xbf16> to vector<256x256xbf16>
    %cst_5 = arith.constant dense<0.000000e+00> : vector<8x256xf32>
    %6 = tpu.matmul %3, %5, %cst_5 {dimension_numbers = #tpu.dot_dimension_numbers<[1], [0], [0], [1], [0, 0, 1, 1], [], []>} : vector<8x256xbf16>, vector<256x256xbf16>, vector<8x256xf32> -> vector<8x256xf32>
    %c0_6 = arith.constant 0 : index
    %c0_7 = arith.constant 0 : index
    %c0_8 = arith.constant 0 : index
    %7 = vector.load %arg4[%c0_6, %c0_7, %c0_8] : memref<1x1x256xf32, #tpu.memory_space<vmem>>, vector<1x1x256xf32>
    %8 = vector.shape_cast %7 : vector<1x1x256xf32> to vector<1x256xf32>
    %9 = vector.broadcast %8 : vector<1x256xf32> to vector<8x256xf32>
    %10 = arith.addf %6, %9 : vector<8x256xf32>
    %cst_9 = arith.constant 0.000000e+00 : f32
    %11 = vector.broadcast %cst_9 : f32 to vector<8x256xf32>
    %12 = arith.maximumf %10, %11 : vector<8x256xf32>
    %13 = arith.truncf %12 : vector<8x256xf32> to vector<8x256xbf16>
    %c0_10 = arith.constant 0 : index
    %c0_11 = arith.constant 0 : index
    %c0_12 = arith.constant 0 : index
    %14 = vector.load %arg5[%c0_10, %c0_11, %c0_12] : memref<1x256x256xbf16, #tpu.memory_space<vmem>>, vector<1x256x256xbf16>
    %15 = vector.shape_cast %14 : vector<1x256x256xbf16> to vector<256x256xbf16>
    %cst_13 = arith.constant dense<0.000000e+00> : vector<8x256xf32>
    %16 = tpu.matmul %13, %15, %cst_13 {dimension_numbers = #tpu.dot_dimension_numbers<[1], [0], [0], [1], [0, 0, 1, 1], [], []>} : vector<8x256xbf16>, vector<256x256xbf16>, vector<8x256xf32> -> vector<8x256xf32>
    %c0_14 = arith.constant 0 : index
    %c0_15 = arith.constant 0 : index
    %c0_16 = arith.constant 0 : index
    %17 = vector.load %arg6[%c0_14, %c0_15, %c0_16] : memref<1x1x256xf32, #tpu.memory_space<vmem>>, vector<1x1x256xf32>
    %18 = vector.shape_cast %17 : vector<1x1x256xf32> to vector<1x256xf32>
    %19 = vector.broadcast %18 : vector<1x256xf32> to vector<8x256xf32>
    %20 = arith.addf %16, %19 : vector<8x256xf32>
    %cst_17 = arith.constant 0.000000e+00 : f32
    %21 = vector.broadcast %cst_17 : f32 to vector<8x256xf32>
    %22 = arith.maximumf %20, %21 : vector<8x256xf32>
    %c0_18 = arith.constant 0 : index
    %c0_19 = arith.constant 0 : index
    %c0_20 = arith.constant 0 : index
    %23 = vector.load %arg2[%c0_18, %c0_19, %c0_20] : memref<1x8x1xf32, #tpu.memory_space<vmem>>, vector<1x8x1xf32>
    %24 = vector.shape_cast %23 : vector<1x8x1xf32> to vector<8x1xf32>
    %25 = vector.broadcast %24 : vector<8x1xf32> to vector<8x256xf32>
    %26 = arith.mulf %22, %25 : vector<8x256xf32>
    %27 = vector.extract_strided_slice %26 {offsets = [0, 0], sizes = [2, 256], strides = [1, 1]} : vector<8x256xf32> to vector<2x256xf32>
    %28 = vector.extract_strided_slice %26 {offsets = [2, 0], sizes = [2, 256], strides = [1, 1]} : vector<8x256xf32> to vector<2x256xf32>
    %29 = arith.addf %27, %28 : vector<2x256xf32>
    %30 = vector.extract_strided_slice %26 {offsets = [4, 0], sizes = [2, 256], strides = [1, 1]} : vector<8x256xf32> to vector<2x256xf32>
    %31 = arith.addf %29, %30 : vector<2x256xf32>
    %32 = vector.extract_strided_slice %26 {offsets = [6, 0], sizes = [2, 256], strides = [1, 1]} : vector<8x256xf32> to vector<2x256xf32>
    %33 = arith.addf %31, %32 : vector<2x256xf32>
    %34 = arith.index_cast %arg0 : i32 to index
    %c0_21 = arith.constant 0 : index
    %c0_22 = arith.constant 0 : index
    %35 = vector.load %arg10[%34, %c0_21, %c0_22] : memref<7x2x256xf32, #tpu.memory_space<vmem>>, vector<1x2x256xf32>
    %36 = vector.shape_cast %35 : vector<1x2x256xf32> to vector<2x256xf32>
    %37 = vector.shape_cast %33 : vector<2x256xf32> to vector<1x2x256xf32>
    tpu.vector_store %arg10[%34, %c0_21, %c0_22], %37 {strides = array<i32>} : memref<7x2x256xf32, #tpu.memory_space<vmem>>, vector<1x2x256xf32>,
    %c6_i32 = arith.constant 6 : i32
    %38 = arith.cmpi eq, %arg0, %c6_i32 : i32
    %39 = arith.extui %38 : i1 to i32
    %c0_i32 = arith.constant 0 : i32
    %40 = arith.cmpi ne, %39, %c0_i32 : i32
    scf.if %40 {
      %c0_23 = arith.constant 0 : index
      %c0_24 = arith.constant 0 : index
      %c0_25 = arith.constant 0 : index
      %41 = vector.load %arg10[%c0_23, %c0_24, %c0_25] : memref<7x2x256xf32, #tpu.memory_space<vmem>>, vector<1x2x256xf32>
      %42 = vector.shape_cast %41 : vector<1x2x256xf32> to vector<2x256xf32>
      %c1 = arith.constant 1 : index
      %c0_26 = arith.constant 0 : index
      %c0_27 = arith.constant 0 : index
      %43 = vector.load %arg10[%c1, %c0_26, %c0_27] : memref<7x2x256xf32, #tpu.memory_space<vmem>>, vector<1x2x256xf32>
      %44 = vector.shape_cast %43 : vector<1x2x256xf32> to vector<2x256xf32>
      %c2 = arith.constant 2 : index
      %c0_28 = arith.constant 0 : index
      %c0_29 = arith.constant 0 : index
      %45 = vector.load %arg10[%c2, %c0_28, %c0_29] : memref<7x2x256xf32, #tpu.memory_space<vmem>>, vector<1x2x256xf32>
      %46 = vector.shape_cast %45 : vector<1x2x256xf32> to vector<2x256xf32>
      %c3 = arith.constant 3 : index
      %c0_30 = arith.constant 0 : index
      %c0_31 = arith.constant 0 : index
      %47 = vector.load %arg10[%c3, %c0_30, %c0_31] : memref<7x2x256xf32, #tpu.memory_space<vmem>>, vector<1x2x256xf32>
      %48 = vector.shape_cast %47 : vector<1x2x256xf32> to vector<2x256xf32>
      %c4 = arith.constant 4 : index
      %c0_32 = arith.constant 0 : index
      %c0_33 = arith.constant 0 : index
      %49 = vector.load %arg10[%c4, %c0_32, %c0_33] : memref<7x2x256xf32, #tpu.memory_space<vmem>>, vector<1x2x256xf32>
      %50 = vector.shape_cast %49 : vector<1x2x256xf32> to vector<2x256xf32>
      %c5 = arith.constant 5 : index
      %c0_34 = arith.constant 0 : index
      %c0_35 = arith.constant 0 : index
      %51 = vector.load %arg10[%c5, %c0_34, %c0_35] : memref<7x2x256xf32, #tpu.memory_space<vmem>>, vector<1x2x256xf32>
      %52 = vector.shape_cast %51 : vector<1x2x256xf32> to vector<2x256xf32>
      %c6 = arith.constant 6 : index
      %c0_36 = arith.constant 0 : index
      %c0_37 = arith.constant 0 : index
      %53 = vector.load %arg10[%c6, %c0_36, %c0_37] : memref<7x2x256xf32, #tpu.memory_space<vmem>>, vector<1x2x256xf32>
      %54 = vector.shape_cast %53 : vector<1x2x256xf32> to vector<2x256xf32>
      %55 = tpu.concatenate %42, %44, %46, %48, %50, %52, %54 in 1 : vector<2x256xf32>, vector<2x256xf32>, vector<2x256xf32>, vector<2x256xf32>, vector<2x256xf32>, vector<2x256xf32>, vector<2x256xf32> -> vector<2x1792xf32>
      %56 = arith.truncf %55 : vector<2x1792xf32> to vector<2x1792xbf16>
      %c0_38 = arith.constant 0 : index
      %c0_39 = arith.constant 0 : index
      %57 = vector.load %arg7[%c0_38, %c0_39] : memref<1792x128xbf16, #tpu.memory_space<vmem>>, vector<1792x128xbf16>
      %cst_40 = arith.constant dense<0.000000e+00> : vector<2x128xf32>
      %58 = tpu.matmul %56, %57, %cst_40 {dimension_numbers = #tpu.dot_dimension_numbers<[1], [0], [0], [1], [0, 0, 1, 1], [], []>} : vector<2x1792xbf16>, vector<1792x128xbf16>, vector<2x128xf32> -> vector<2x128xf32>
      %c0_41 = arith.constant 0 : index
      %c0_42 = arith.constant 0 : index
      %59 = vector.load %arg8[%c0_41, %c0_42] : memref<1x128xf32, #tpu.memory_space<vmem>>, vector<1x128xf32>
      %60 = vector.broadcast %59 : vector<1x128xf32> to vector<2x128xf32>
      %61 = arith.addf %58, %60 : vector<2x128xf32>
      %c0_43 = arith.constant 0 : index
      %c0_44 = arith.constant 0 : index
      %62 = vector.load %arg9[%c0_43, %c0_44] : memref<2x128xf32, #tpu.memory_space<vmem>>, vector<2x128xf32>
      tpu.vector_store %arg9[%c0_43, %c0_44], %61 {strides = array<i32>} : memref<2x128xf32, #tpu.memory_space<vmem>>, vector<2x128xf32>,
    } else {
    }
    return
  }
  func.func @transform_0(%arg0: i32) -> (i32, i32, i32) {
    %c0_i32 = arith.constant 0 : i32
    %c0_i32_0 = arith.constant 0 : i32
    %c0_i32_1 = arith.constant 0 : i32
    return %arg0, %c0_i32, %c0_i32_0 : i32, i32, i32
  }
  func.func @transform_1(%arg0: i32) -> (i32, i32, i32) {
    %c0_i32 = arith.constant 0 : i32
    %c0_i32_0 = arith.constant 0 : i32
    %c0_i32_1 = arith.constant 0 : i32
    return %arg0, %c0_i32, %c0_i32_0 : i32, i32, i32
  }
  func.func @transform_2(%arg0: i32) -> (i32, i32, i32) {
    %c0_i32 = arith.constant 0 : i32
    %c0_i32_0 = arith.constant 0 : i32
    %c0_i32_1 = arith.constant 0 : i32
    return %arg0, %c0_i32, %c0_i32_0 : i32, i32, i32
  }
  func.func @transform_3(%arg0: i32) -> (i32, i32, i32) {
    %c0_i32 = arith.constant 0 : i32
    %c0_i32_0 = arith.constant 0 : i32
    %c0_i32_1 = arith.constant 0 : i32
    return %arg0, %c0_i32, %c0_i32_0 : i32, i32, i32
  }
  func.func @transform_4(%arg0: i32) -> (i32, i32, i32) {
    %c0_i32 = arith.constant 0 : i32
    %c0_i32_0 = arith.constant 0 : i32
    %c0_i32_1 = arith.constant 0 : i32
    return %arg0, %c0_i32, %c0_i32_0 : i32, i32, i32
  }
  func.func @transform_5(%arg0: i32) -> (i32, i32, i32) {
    %c0_i32 = arith.constant 0 : i32
    %c0_i32_0 = arith.constant 0 : i32
    %c0_i32_1 = arith.constant 0 : i32
    return %arg0, %c0_i32, %c0_i32_0 : i32, i32, i32
  }
  func.func @transform_6(%arg0: i32) -> (i32, i32) {
    %c0_i32 = arith.constant 0 : i32
    %c0_i32_0 = arith.constant 0 : i32
    %c0_i32_1 = arith.constant 0 : i32
    return %c0_i32, %c0_i32_0 : i32, i32
  }
  func.func @transform_7(%arg0: i32) -> (i32, i32) {
    %c0_i32 = arith.constant 0 : i32
    %c0_i32_0 = arith.constant 0 : i32
    %c0_i32_1 = arith.constant 0 : i32
    return %c0_i32, %c0_i32_0 : i32, i32
  }
  func.func @transform_8(%arg0: i32) -> (i32, i32) {
    %c0_i32 = arith.constant 0 : i32
    %c0_i32_0 = arith.constant 0 : i32
    %c0_i32_1 = arith.constant 0 : i32
    return %c0_i32, %c0_i32_0 : i32, i32
  }
}

</mosaic_0001>

<bundles_post_ra>
// kernel: tpu_custom_call.1
= control target key start
LH: loop header
LB: loop body
LE: loop exit
PB: predicated region body
PF: predicated region fallthrough
CT: control target
= control target key end

     0   :  { %s3654_s0 = inlined_call_operand.vmem [shape: bf16[7,8,256], index: 0, kind: input, shape index: {}]   ;;  %s3655_s1 = inlined_call_operand.vmem [shape: f32[7,8,1], index: 1, kind: input, shape index: {}]   ;;  %s3656_s2 = inlined_call_operand.hbm [shape: bf16[7,256,256], index: 2, kind: input, shape index: {}]   ;;  %s3657_s3 = inlined_call_operand.hbm [shape: f32[7,1,256], index: 3, kind: input, shape index: {}]   ;;  %s3658_s4 = inlined_call_operand.hbm [shape: bf16[7,256,256], index: 4, kind: input, shape index: {}]   ;;  %s3659_s5 = inlined_call_operand.vmem [shape: f32[7,1,256], index: 5, kind: input, shape index: {}]   ;;  %s3660_s6 = inlined_call_operand.hbm [shape: bf16[1792,128], index: 6, kind: input, shape index: {}]   ;;  %s3661_s7 = inlined_call_operand.vmem [shape: f32[1,128], index: 7, kind: input, shape index: {}]   ;;  %s3662_s8 = inlined_call_operand.hbm [shape: f32[2,128], index: 8, kind: output, shape index: {}]  }
   0x1   :  { %3670 = sst [smem:[#allocation19_spill]] %s3657_s3 }
   0x2   :  { %3671 = sst [smem:[#allocation20_spill]] %s3661_s7 }
   0x3   :  { %3672 = sst [smem:[#allocation21_spill]] %s3662_s8 }
   0x4   :  { %13 = vsyncpa [#allocation4], 0 }
   0x5   :  { %15 = vsyncpa [#allocation4 + $0x1], 0 }
   0x6   :  { %16 = vsyncpa [#allocation7], 0 }
   0x7   :  { %18 = vsyncpa [#allocation7 + $0x1], 0 }
   0x8   :  { %19 = vsyncpa [#allocation10], 0 }
   0x9   :  { %20 = vsyncpa [#allocation5], 0  ;;  %s3338_s27 = smov 0   ;;  %s3340_s28 = smov 0  }
   0xa   :  { %s3342_s29 = smov 0   ;;  %s3344_s30 = smov 0  }
   0xb LB: > { %3673 = sst [smem:[#allocation16_spill]] %s3277_s29  ;;  %s3359_s9 = sadd.s32 1, %s3281_s30   ;;  %s3281_s30 = sphi %s3344_s30, %s3690_s30   ;;  %s3277_s29 = sphi %s3342_s29, %s3692_s29   ;;  %s3273_s28 = sphi %s3340_s28, %s3694_s28   ;;  %s3269_s27 = sphi %s3338_s27, %s3693_s27  }
   0xc   : > { %3674 = sst [smem:[#allocation17_spill]] %s3359_s9  ;;  %s85_s10 = sadd.s32 1, %s3277_s29 }
   0xd   : > { %s82_s11 = ssub.s32 %s3281_s30, %s3359_s9  ;;  %p92_p0 = scmp.ne.s32.totalorder %s3277_s29, %s3273_s28 }
   0xe   : > { %p83_p1 = scmp.eq.s32.totalorder %s82_s11, 0  ;;  %p93_p2 = scmp.eq.s32.totalorder %s3281_s30, 0 }
   0xf   : > { %p2849_p3 = scmp.lt.s32.totalorder %s3281_s30, 7  ;;  %s3372_s13 = sand.u32 1, %s3277_s29  }
  0x10   : > { %s3369_s12 = scalar_select %p83_p1, %s3277_s29, %s85_s10  }
  0x11   : > { %p94_p4 = por %p93_p2, %p92_p0  ;;  %s315_s15 = sand.u32 1, %s3281_s30  }
  0x12   : > { %3675 = sst [smem:[#allocation18_spill]] %s3369_s12  ;;  %s2452_s17 = sshll.u32 %s3372_s13, 1 }
  0x13   : > { %p3376_p5 = pnand %p2849_p3, %p94_p4  ;;  %s2662_s18 = sshll.u32 %s3281_s30, 5 }
  0x14   : > { %s3677_s3 = sld [smem:[#allocation19_spill]]  ;;  %s319_s22 = scalar_lea.vmem [#allocation6], %s2452_s17 }
  0x15   : > { %s327_s23 = sshll.u32 %s319_s22, 4  ;;  %s3387_s24 = scalar_lea.sflag [#allocation7], %s315_s15  ;;  %s328_s23 = int_to_ptr.vmem [resolvable:$true] %s327_s23 }
  0x16   : > { %p3393_p7 = pneg %p3376_p5 }
  0x1a   : > { %s3385_s21 = scalar_lea.hbm %s3677_s3, %s2662_s18  ;;  %s3106_s18 = scalar_lea.hbm %s3677_s3, 224 }
  0x1b   : > { %s3101_s25 = scalar_lea.hbm %s3385_s21, 32  ;;  %p3107_p10 = scmp.lt.s32.totalorder %s3385_s21, %s3677_s3 }
  0x1c   : > { %p3102_p6 = scmp.ne.s32.totalorder %s3385_s21, %s3101_s25  ;;  %p3108_p11 = scmp.lt.s32.totalorder %s3106_s18, %s3101_s25 }
  0x1e   : > { %p3104_p8 = pnand %p3393_p7, %p3102_p6  ;;  %p3109_p12 = por %p3108_p11, %p3107_p10 }
  0x20   : > { %p3105_p9 = pneg %p3104_p8 }
  0x22   : > { %p3110_p13 = pnand %p3109_p12, %p3105_p9 }
  0x24   : > { %3113 = shalt.err (!%p3110_p13)
}
  0x25   : > { %s3114_s15 = scalar_lea.vmem %s328_s23, 32  ;;  %s3283_s20 = smov [#allocation6]  }
  0x26   : > { %p3115_p0 = scmp.ne.s32.totalorder %s328_s23, %s3114_s15  ;;  %s3119_s22 = sshll.u32 %s3283_s20, 4  ;;  %s3120_s22 = int_to_ptr.vmem [resolvable:$false] %s3119_s22 }
  0x27   : > { %s3121_s14 = scalar_lea.vmem %s3120_s22, 64  ;;  %p3122_p3 = scmp.lt.s32.totalorder %s328_s23, %s3120_s22 }
  0x28   : > { %p3117_p1 = pnand %p3115_p0, %p3393_p7  ;;  %p3123_p4 = scmp.lt.s32.totalorder %s3121_s14, %s3114_s15 }
  0x2a   : > { %p3118_p2 = pneg %p3117_p1  ;;  %p3124_p6 = por %p3123_p4, %p3122_p3 }
  0x2c   : > { %p3125_p8 = pnand %p3124_p6, %p3118_p2 }
  0x2e   : > { %3128 = shalt.err (!%p3125_p8)
}
  0x2f   : > { %2844 = dma.hbm_to_vmem [thread:$0]  (!%p3376_p5), %s3385_s21, 32, %s328_s23, %s3387_s24  }
  0x30   : > { %s3679_s25 = sshll.u32 %s3372_s13, 8  ;;  %s3417_s14 = sadd.s32 4294967295, %s3281_s30  }
  0x31   : > { %s338_s10 = scalar_lea.vmem [#allocation8], %s3679_s25  ;;  %p98_p9 = scmp.ne.s32.totalorder %s3273_s28, %s3269_s27 }
  0x32   : > { %s345_s11 = sshll.u32 %s338_s10, 4  ;;  %p3667_p10 = scmp.eq.s32.totalorder %s3417_s14, 0  ;;  %s3414_s11 = int_to_ptr.vmem [resolvable:$true] %s345_s11 }
  0x33   : > { %p2446_p11 = scmp.ge.s32.totalorder %s3281_s30, 1  ;;  %p250_p12 = scmp.lt.s32.totalorder %s3281_s30, 8 }
  0x34   : > { %p3426_p13 = por %p3667_p10, %p98_p9  ;;  %s3284_s18 = smov [#allocation9]  }
  0x35   : > { %p3430_p0 = pnand %p2446_p11, %p250_p12  ;;  %s262_s17 = sshll.u32 %s3284_s18, 4  ;;  %s263_s17 = int_to_ptr.vmem [resolvable:$true] %s262_s17 }
  0x36   : > { %s3680_s21 = scalar_select %p3426_p13, 1, 0 }
  0x37   : > { %s3681_s23 = scalar_select %p3430_p0, 1, 0 }
  0x38   : > { %p2834_p1 = pneg %p3430_p0  ;;  %s3663_s19 = sshll.u32 %s3281_s30, 12 }
  0x39   : > { %s3448_s22 = scalar_lea.hbm %s3656_s2, %s3663_s19  ;;  %s298_s10 = scalar_lea.vmem [#allocation3], %s3679_s25 }
  0x3a   : > { %p3438_p2 = pnand %p2834_p1, %p3667_p10  ;;  %s305_s3 = sshll.u32 %s298_s10, 4  ;;  %s3452_s3 = int_to_ptr.vmem [resolvable:$true] %s305_s3 }
  0x3b   : > { %s3140_s18 = scalar_lea.vmem %s263_s17, 14336  ;;  %p3148_p9 = scmp.lt.s32.totalorder %s263_s17, %s263_s17 }
  0x3c   : > { %p3131_p3 = pneg %p3438_p2  ;;  %p3141_p4 = scmp.ne.s32.totalorder %s263_s17, %s3140_s18 }
  0x3d   : > { %p3149_p11 = scmp.lt.s32.totalorder %s3140_s18, %s3140_s18 }
  0x3e   : > { %p3143_p6 = pnand %p3141_p4, %p3131_p3 }
  0x3f   : > { %p3150_p12 = por %p3149_p11, %p3148_p9 }
  0x40   : > { %p3144_p8 = pneg %p3143_p6 }
  0x42   : > { %p3151_p1 = pnand %p3150_p12, %p3144_p8 }
  0x44   : > { %3154 = shalt.err (!%p3151_p1)
}
  0x45   : > { %s3285_s12 = smov 64   ;;  %s3286_s15 = smov 4  }
  0x46   : > { %2837 = dma.hbm_to_vmem [thread:$0]  (!%p3438_p2), %s3660_s6, 14336, %s263_s17, [#allocation10], %s3285_s12, %s3285_s12, %s3286_s15  }
  0x47   : > { %s295_s10 = scalar_lea.sflag [#allocation4], %s3372_s13  ;;  %s3155_s19 = scalar_lea.hbm %s3448_s22, 4096 }
  0x48   : > { %p3156_p3 = scmp.ne.s32.totalorder %s3448_s22, %s3155_s19  ;;  %s3160_s9 = scalar_lea.hbm %s3656_s2, 28672 }
  0x49   : > { %p3161_p8 = scmp.lt.s32.totalorder %s3448_s22, %s3656_s2  ;;  %p3162_p9 = scmp.lt.s32.totalorder %s3160_s9, %s3155_s19 }
  0x4a   : > { %p3158_p4 = pnand %p3156_p3, %p3393_p7 }
  0x4b   : > { %p3163_p11 = por %p3162_p9, %p3161_p8 }
  0x4c   : > { %p3159_p6 = pneg %p3158_p4 }
  0x4e   : > { %p3164_p12 = pnand %p3163_p11, %p3159_p6 }
  0x50   : > { %3167 = shalt.err (!%p3164_p12)
}
  0x51   : > { %s3168_s12 = scalar_lea.vmem %s3452_s3, 4096  ;;  %s3287_s17 = smov [#allocation3]  }
  0x52   : > { %p3169_p2 = scmp.ne.s32.totalorder %s3452_s3, %s3168_s12  ;;  %s3173_s29 = sshll.u32 %s3287_s17, 4  ;;  %s3174_s29 = int_to_ptr.vmem [resolvable:$false] %s3173_s29 }
  0x53   : > { %s3175_s27 = scalar_lea.vmem %s3174_s29, 8192  ;;  %p3176_p4 = scmp.lt.s32.totalorder %s3452_s3, %s3174_s29 }
  0x54   : > { %p3171_p1 = pnand %p3169_p2, %p3393_p7  ;;  %p3177_p10 = scmp.lt.s32.totalorder %s3175_s27, %s3168_s12 }
  0x56   : > { %p3172_p3 = pneg %p3171_p1  ;;  %p3178_p13 = por %p3177_p10, %p3176_p4 }
  0x58   : > { %p3179_p0 = pnand %p3178_p13, %p3172_p3 }
  0x5a   : > { %3182 = shalt.err (!%p3179_p0)
}
  0x5b   : > { %s3288_s7 = smov 128   ;;  %s3289_s8 = smov 8  }
  0x5c   : > { %2841 = dma.hbm_to_vmem [thread:$0]  (!%p3376_p5), %s3448_s22, 4096, %s3452_s3, %s295_s10, %s3288_s7, %s3288_s7, %s3289_s8  }
  0x5d   : > { %s3683_s9 = sshll.u32 %s3281_s30, 12  ;;  %s3188_s17 = scalar_lea.hbm %s3658_s4, 28672 }
  0x5e   : > { %s344_s20 = scalar_lea.hbm %s3658_s4, %s3683_s9 }
  0x5f   : > { %s3183_s25 = scalar_lea.hbm %s344_s20, 4096  ;;  %p3189_p6 = scmp.lt.s32.totalorder %s344_s20, %s3658_s4 }
  0x60   : > { %p3184_p10 = scmp.ne.s32.totalorder %s344_s20, %s3183_s25  ;;  %p3190_p8 = scmp.lt.s32.totalorder %s3188_s17, %s3183_s25 }
  0x62   : > { %p3186_p13 = pnand %p3184_p10, %p3393_p7  ;;  %p3191_p9 = por %p3190_p8, %p3189_p6 }
  0x64   : > { %p3187_p0 = pneg %p3186_p13 }
  0x66   : > { %p3192_p11 = pnand %p3191_p9, %p3187_p0 }
  0x68   : > { %3195 = shalt.err (!%p3192_p11)
}
  0x69   : > { %s3196_s3 = scalar_lea.vmem %s3414_s11, 4096  ;;  %s3290_s30 = smov [#allocation8]  }
  0x6a   : > { %p3197_p12 = scmp.ne.s32.totalorder %s3414_s11, %s3196_s3  ;;  %s3201_s13 = sshll.u32 %s3290_s30, 4  ;;  %s3202_s13 = int_to_ptr.vmem [resolvable:$false] %s3201_s13 }
  0x6b   : > { %s3203_s22 = scalar_lea.vmem %s3202_s13, 8192  ;;  %p3204_p3 = scmp.lt.s32.totalorder %s3414_s11, %s3202_s13 }
  0x6c   : > { %p3199_p2 = pnand %p3197_p12, %p3393_p7  ;;  %p3205_p4 = scmp.lt.s32.totalorder %s3203_s22, %s3196_s3 }
  0x6e   : > { %p3200_p1 = pneg %p3199_p2  ;;  %p3206_p10 = por %p3205_p4, %p3204_p3 }
  0x70   : > { %p3207_p13 = pnand %p3206_p10, %p3200_p1 }
  0x72   : > { %3210 = shalt.err (!%p3207_p13)
}
  0x73   : > { %2847 = dma.hbm_to_vmem [thread:$0]  (!%p3376_p5), %s344_s20, 4096, %s3414_s11, %s3387_s24, %s3288_s7, %s3288_s7, %s3289_s8  }
  0x74   : > { %p3684_p7 = scmp.ne.s32.totalorder %s3681_s23, 0 }
  0x75   : > { %s366_s26 = sand.u32 (!%p3684_p7), 1, %s3273_s28   ;;  %p3685_p0 = scmp.ne.s32.totalorder (!%p3684_p7), %s3680_s21, 0 }
  0x76   : > { %364 = sbr.rel (%p3684_p7) target bundleno = 959 (0x3bf), region = 52  ;;  %s2459_s10 = sshll.u32 (!%p3684_p7), %s366_s26, 8 }
  0x77   : > { %s367_s9 = scalar_lea.sflag (!%p3684_p7), [#allocation4], %s366_s26  ;;  %s3515_s19 = scalar_lea.vmem (!%p3684_p7), [#allocation3], %s2459_s10 }
  0x7b   : > { %3252 = dma.done.wait (%p3685_p0), %s367_s9, 4096  }
  0x7c   : > { %3254 = vsyncadd (%p3685_p0), %s367_s9, 4294963200  ;;  %s375_s16 = sand.u32 1, %s3417_s14   ;;  %s2460_s15 = sshll.u32 %s366_s26, 1 }
  0x7d   : > { %s376_s24 = scalar_lea.sflag [#allocation7], %s375_s16  ;;  %s3522_s11 = scalar_lea.vmem [#allocation6], %s2460_s15 }
  0x7e   : > { %3256 = dma.done.wait (%p3685_p0), %s376_s24, 4128  }
  0x7f   : > { %3258 = vsyncadd (%p3685_p0), %s376_s24, 4294963168  ;;  %s3528_s23 = scalar_lea.vmem [#allocation8], %s2459_s10  ;;  %p3686_p5 = scmp.eq.s32.totalorder %s3417_s14, 0 }
  0x81   : > { %3260 = dma.done.wait (%p3686_p5), [#allocation10], 14336   ;;  %p3687_p6 = pmov %p3686_p5 }
  0x82   : > { %v3291_v0 = vmov 0   ;;  %v2893_v1 = vld [vmem:[%s3515_s19 + $0x74] ss:$8 sps:$4 sm:$0xff]   ;;  %v2895_v2 = vld [vmem:[%s3515_s19 + $0x70] ss:$8 sps:$4 sm:$0xff]   ;;  %p443_p8 = scmp.lt.s32.totalorder %s3417_s14, 6 }
  0x83   : > { %3262 = vsyncadd (%p3687_p6), [#allocation10], 4294952960  ;;  %2892 = vset.pattern.permute.xlu0 %v3291_v0  ;;  %670 = vmatprep.subr.bf16.mxu0 %v2893_v1  ;;  %v2896_v3 = vld [vmem:[%s3515_s19 + $0x64] ss:$8 sps:$4 sm:$0xff]   ;;  %v2898_v4 = vld [vmem:[%s3515_s19 + $0x60] ss:$8 sps:$4 sm:$0xff]  }
  0x84   : > { %671 = vmatpush1.bf16.msra.mxu0 %v2895_v2  ;;  %v2899_v5 = vld [vmem:[%s3515_s19 + $0x54] ss:$8 sps:$4 sm:$0xff]   ;;  %v2901_v6 = vld [vmem:[%s3515_s19 + $0x50] ss:$8 sps:$4 sm:$0xff]   ;;  %v2902_v7 = vld [vmem:[%s3515_s19 + $0x44] ss:$8 sps:$4 sm:$0xff]  }
  0x85   : > { %672 = vmatprep.subr.bf16.mxu0 %v2896_v3  ;;  %v2904_v8 = vld [vmem:[%s3515_s19 + $0x40] ss:$8 sps:$4 sm:$0xff]   ;;  %s3544_s21 = scalar_select %p443_p8, %s3417_s14, 6  ;;  %v2905_v9 = vld [vmem:[%s3515_s19 + $0x34] ss:$8 sps:$4 sm:$0xff]  }
  0x86   : > { %v2907_v10 = vld [vmem:[%s3515_s19 + $0x30] ss:$8 sps:$4 sm:$0xff]   ;;  %v2908_v11 = vld [vmem:[%s3515_s19 + $0x24] ss:$8 sps:$4 sm:$0xff]   ;;  %v2910_v12 = vld [vmem:[%s3515_s19 + $0x20] ss:$8 sps:$4 sm:$0xff]  }
  0x87   : > { %s2664_s7 = sshll.u32 %s3544_s21, 3  ;;  %v2911_v13 = vld [vmem:[%s3515_s19 + $0x14] ss:$8 sps:$4 sm:$0xff]   ;;  %v2913_v14 = vld [vmem:[%s3515_s19 + $0x10] ss:$8 sps:$4 sm:$0xff]   ;;  %s2466_s29 = sshll.u32 %s3544_s21, 1 }
  0x88   : > { %673 = vmatpush1.bf16.msra.mxu0 %v2898_v4  ;;  %s447_s25 = scalar_lea.vmem %s3654_s0, %s2664_s7  ;;  %v2941_v17 = vld [vmem:[%s3528_s23 + $0x74] ss:$8 sps:$4 sm:$0xff]   ;;  %v2943_v18 = vld [vmem:[%s3528_s23 + $0x70] ss:$8 sps:$4 sm:$0xff]   ;;  %v2944_v19 = vld [vmem:[%s3528_s23 + $0x64] ss:$8 sps:$4 sm:$0xff]   ;;  %s451_s17 = scalar_lea.vmem %s3655_s1, %s2664_s7 }
  0x89   : > { %674 = vmatprep.subr.bf16.mxu0 %v2899_v5  ;;  %v457_v15 = vld [vmem:[%s447_s25] sm:$0xff]  ;;  %919 = vmatprep.subr.bf16.mxu1 %v2941_v17  ;;  %v2947_v23 = vld [vmem:[%s3528_s23 + $0x54] ss:$8 sps:$4 sm:$0xff]   ;;  %v2917_v25 = vld [vmem:[%s3515_s19 + $0xf4] ss:$8 sps:$4 sm:$0xff]   ;;  %s455_s30 = scalar_lea.vmem %s3659_s5, %s2466_s29  ;;  %s2665_s13 = sshll.u32 %s3417_s14, 2 }
  0x8a   : > { %v3558_v16 = vmax.bf16 %v3291_v0, %v457_v15  ;;  %v2914_v20 = vld [vmem:[%s3515_s19 + $0x4] ss:$8 sps:$4 sm:$0xff]   ;;  %920 = vmatpush1.bf16.msra.mxu1 %v2943_v18  ;;  %v2916_v24 = vld [vmem:[%s3515_s19] ss:$8 sps:$4 sm:$0xff]   ;;  %v2949_v26 = vld [vmem:[%s3528_s23 + $0x50] ss:$8 sps:$4 sm:$0xff]  }
  0x8b   : > { %v2946_v22 = vld [vmem:[%s3528_s23 + $0x60] ss:$8 sps:$4 sm:$0xff]   ;;  %921 = vmatprep.subr.bf16.mxu1 %v2944_v19  ;;  %v2950_v27 = vld [vmem:[%s3528_s23 + $0x44] ss:$8 sps:$4 sm:$0xff]   ;;  %v2953_v31 = vld [vmem:[%s3528_s23 + $0x34] ss:$8 sps:$4 sm:$0xff]  }
  0x8c   : > { %675 = vmatpush1.bf16.msra.mxu0 %v2901_v6  ;;  %v2468_v21 = vcombine.high %v3558_v16, %v3558_v16  ;;  %v2919_v28 = vld [vmem:[%s3515_s19 + $0xf0] ss:$8 sps:$4 sm:$0xff]   ;;  %v2920_v29 = vld [vmem:[%s3515_s19 + $0xe4] ss:$8 sps:$4 sm:$0xff]   ;;  %v2922_v32 = vld [vmem:[%s3515_s19 + $0xe0] ss:$8 sps:$4 sm:$0xff]   ;;  %v2467_v58 = vcombine.low %v3558_v16, %v3558_v16  ;;  %v493_v6 = vlaneseq }
  0x8d   : > { %676 = vmatprep.subr.bf16.mxu0 %v2902_v7  ;;  %v2952_v30 = vld [vmem:[%s3528_s23 + $0x40] ss:$8 sps:$4 sm:$0xff]   ;;  %v2923_v33 = vld [vmem:[%s3515_s19 + $0xd4] ss:$8 sps:$4 sm:$0xff]   ;;  %v2956_v35 = vld [vmem:[%s3528_s23 + $0x24] ss:$8 sps:$4 sm:$0xff]  }
  0x8e   : > { %702 = vmatprep.mubr.bf16.mxu0 %v2468_v21  ;;  %922 = vmatpush1.bf16.msra.mxu1 %v2946_v22  ;;  %v2955_v34 = vld [vmem:[%s3528_s23 + $0x30] ss:$8 sps:$4 sm:$0xff]   ;;  %v2925_v36 = vld [vmem:[%s3515_s19 + $0xd0] ss:$8 sps:$4 sm:$0xff]   ;;  %v2926_v37 = vld [vmem:[%s3515_s19 + $0xc4] ss:$8 sps:$4 sm:$0xff]  }
  0x8f   : > { %923 = vmatprep.subr.bf16.mxu1 %v2947_v23  ;;  %v2958_v38 = vld [vmem:[%s3528_s23 + $0x20] ss:$8 sps:$4 sm:$0xff]   ;;  %v2959_v39 = vld [vmem:[%s3528_s23 + $0x14] ss:$8 sps:$4 sm:$0xff]   ;;  %v2929_v41 = vld [vmem:[%s3515_s19 + $0xb4] ss:$8 sps:$4 sm:$0xff]  }
  0x90   : > { %677 = vmatpush1.bf16.msra.mxu0 %v2904_v8  ;;  %v2928_v40 = vld [vmem:[%s3515_s19 + $0xc0] ss:$8 sps:$4 sm:$0xff]   ;;  %v2961_v42 = vld [vmem:[%s3528_s23 + $0x10] ss:$8 sps:$4 sm:$0xff]   ;;  %v2931_v44 = vld [vmem:[%s3515_s19 + $0xb0] ss:$8 sps:$4 sm:$0xff]  }
  0x91   : > { %678 = vmatprep.subr.bf16.mxu0 %v2905_v9  ;;  %v2962_v43 = vld [vmem:[%s3528_s23 + $0x4] ss:$8 sps:$4 sm:$0xff]   ;;  %v2932_v45 = vld [vmem:[%s3515_s19 + $0xa4] ss:$8 sps:$4 sm:$0xff]   ;;  %v2965_v47 = vld [vmem:[%s3528_s23 + $0xf4] ss:$8 sps:$4 sm:$0xff]  }
  0x92   : > { %924 = vmatpush1.bf16.msra.mxu1 %v2949_v26  ;;  %v2964_v46 = vld [vmem:[%s3528_s23] ss:$8 sps:$4 sm:$0xff]   ;;  %v2934_v48 = vld [vmem:[%s3515_s19 + $0xa0] ss:$8 sps:$4 sm:$0xff]   ;;  %v2935_v49 = vld [vmem:[%s3515_s19 + $0x94] ss:$8 sps:$4 sm:$0xff]  }
  0x93   : > { %925 = vmatprep.subr.bf16.mxu1 %v2950_v27  ;;  %v2967_v50 = vld [vmem:[%s3528_s23 + $0xf0] ss:$8 sps:$4 sm:$0xff]   ;;  %v2968_v51 = vld [vmem:[%s3528_s23 + $0xe4] ss:$8 sps:$4 sm:$0xff]   ;;  %v2938_v53 = vld [vmem:[%s3515_s19 + $0x84] ss:$8 sps:$4 sm:$0xff]  }
  0x94   : > { %679 = vmatpush1.bf16.msra.mxu0 %v2907_v10  ;;  %v2937_v52 = vld [vmem:[%s3515_s19 + $0x90] ss:$8 sps:$4 sm:$0xff]   ;;  %v2970_v54 = vld [vmem:[%s3528_s23 + $0xe0] ss:$8 sps:$4 sm:$0xff]   ;;  %v2940_v56 = vld [vmem:[%s3515_s19 + $0x80] ss:$8 sps:$4 sm:$0xff]  }
  0x95   : > { %680 = vmatprep.subr.bf16.mxu0 %v2908_v11  ;;  %v2971_v55 = vld [vmem:[%s3528_s23 + $0xd4] ss:$8 sps:$4 sm:$0xff]   ;;  %v2973_v57 = vld [vmem:[%s3528_s23 + $0xd0] ss:$8 sps:$4 sm:$0xff]   ;;  %v2974_v59 = vld [vmem:[%s3528_s23 + $0xc4] ss:$8 sps:$4 sm:$0xff]  }
  0x96   : > { %926 = vmatpush1.bf16.msra.mxu1 %v2952_v30  ;;  %v2976_v60 = vld [vmem:[%s3528_s23 + $0xc0] ss:$8 sps:$4 sm:$0xff]   ;;  %v2977_v61 = vld [vmem:[%s3528_s23 + $0xb4] ss:$8 sps:$4 sm:$0xff]   ;;  %v2979_v62 = vld [vmem:[%s3528_s23 + $0xb0] ss:$8 sps:$4 sm:$0xff]  }
  0x97   : > { %927 = vmatprep.subr.bf16.mxu1 %v2953_v31  ;;  %v2980_v63 = vld [vmem:[%s3528_s23 + $0xa4] ss:$8 sps:$4 sm:$0xff]   ;;  %v2982_v0 = vld [vmem:[%s3528_s23 + $0xa0] ss:$8 sps:$4 sm:$0xff]   ;;  %v2983_v1 = vld [vmem:[%s3528_s23 + $0x94] ss:$8 sps:$4 sm:$0xff]  }
  0x98   : > { %681 = vmatpush1.bf16.msra.mxu0 %v2910_v12  ;;  %v2985_v2 = vld [vmem:[%s3528_s23 + $0x90] ss:$8 sps:$4 sm:$0xff]   ;;  %v2986_v3 = vld [vmem:[%s3528_s23 + $0x84] ss:$8 sps:$4 sm:$0xff]   ;;  %v2988_v4 = vld [vmem:[%s3528_s23 + $0x80] ss:$8 sps:$4 sm:$0xff]  }
  0x99   : > { %682 = vmatprep.subr.bf16.mxu0 %v2911_v13  ;;  %v962_v5 = vld [vmem:[%s451_s17] sm:$0xff]  ;;  %v494_v7 = vshrl.u32 %v493_v6, 7  ;;  %v491_v9 = vld [vmem:[%s3522_s11] sm:$0x3]  ;;  %s1003_s22 = scalar_lea.vmem [#allocation2], %s2665_s13  ;;  %p2536_p9 = scmp.ne.s32.totalorder %s3417_s14, 6 }
  0x9a   : > { %928 = vmatpush1.bf16.msra.mxu1 %v2955_v34  ;;  %965 = vperm.xlu0 %2892, %v962_v5   ;;  %v747_v23 = vld [vmem:[%s455_s30] sm:$0x3]  ;;  %s3688_s9 = sld [smem:[#allocation20_spill]] (!%p2536_p9) }
  0x9b   : > { %929 = vmatprep.subr.bf16.mxu1 %v2956_v35  ;;  %v495_v8 = vsub.s32 0, %v494_v7  ;;  %v499_v10 = vsub.s32 1, %v494_v7 }
  0x9c   : > { %683 = vmatpush1.bf16.msra.mxu0 %v2913_v14 }
  0x9d   : > { %684 = vmatprep.subr.bf16.mxu0 %v2914_v20  ;;  %v496_v11 = vrot.slane %v491_v9, %v495_v8  ;;  %v500_v12 = vrot.slane %v491_v9, %v499_v10 }
  0x9e   : > { %930 = vmatpush1.bf16.msra.mxu1 %v2958_v38 }
  0x9f   : > { %931 = vmatprep.subr.bf16.mxu1 %v2959_v39 }
  0xa0   : > { %685 = vmatpush1.bf16.msra.mxu0 %v2916_v24  ;;  %v752_v24 = vrot.slane %v747_v23, %v495_v8 }
  0xa1   : > { %686 = vmatprep.subr.bf16.mxu0 %v2917_v25  ;;  %v756_v25 = vrot.slane %v747_v23, %v499_v10 }
  0xa2   : > { %932 = vmatpush1.bf16.msra.mxu1 %v2961_v42 }
  0xa3   : > { %933 = vmatprep.subr.bf16.mxu1 %v2962_v43 }
  0xa4   : > { %687 = vmatpush2.bf16.msra.mxu0 %v2919_v28 }
  0xa5   : > { %688 = vmatprep.subr.bf16.mxu0 %v2920_v29 }
  0xa6   : > { %934 = vmatpush1.bf16.msra.mxu1 %v2964_v46 }
  0xa7   : > { %935 = vmatprep.subr.bf16.mxu1 %v2965_v47 }
  0xa8   : > { %689 = vmatpush2.bf16.msra.mxu0 %v2922_v32 }
  0xa9   : > { %690 = vmatprep.subr.bf16.mxu0 %v2923_v33 }
  0xaa   : > { %936 = vmatpush2.bf16.msra.mxu1 %v2967_v50 }
  0xab   : > { %937 = vmatprep.subr.bf16.mxu1 %v2968_v51 }
  0xac   : > { %691 = vmatpush2.bf16.msra.mxu0 %v2925_v36 }
  0xad   : > { %692 = vmatprep.subr.bf16.mxu0 %v2926_v37 }
  0xae   : > { %938 = vmatpush2.bf16.msra.mxu1 %v2970_v54 }
  0xaf   : > { %939 = vmatprep.subr.bf16.mxu1 %v2971_v55 }
  0xb0   : > { %693 = vmatpush2.bf16.msra.mxu0 %v2928_v40 }
  0xb1   : > { %694 = vmatprep.subr.bf16.mxu0 %v2929_v41 }
  0xb2   : > { %940 = vmatpush2.bf16.msra.mxu1 %v2973_v57 }
  0xb3   : > { %941 = vmatprep.subr.bf16.mxu1 %v2974_v59 }
  0xb4   : > { %695 = vmatpush2.bf16.msra.mxu0 %v2931_v44 }
  0xb5   : > { %696 = vmatprep.subr.bf16.mxu0 %v2932_v45 }
  0xb6   : > { %942 = vmatpush2.bf16.msra.mxu1 %v2976_v60 }
  0xb7   : > { %943 = vmatprep.subr.bf16.mxu1 %v2977_v61 }
  0xb8   : > { %697 = vmatpush2.bf16.msra.mxu0 %v2934_v48 }
  0xb9   : > { %698 = vmatprep.subr.bf16.mxu0 %v2935_v49 }
  0xba   : > { %944 = vmatpush2.bf16.msra.mxu1 %v2979_v62 }
  0xbb   : > { %945 = vmatprep.subr.bf16.mxu1 %v2980_v63 }
  0xbc   : > { %699 = vmatpush2.bf16.msra.mxu0 %v2937_v52 }
  0xbd   : > { %700 = vmatprep.subr.bf16.mxu0 %v2938_v53 }
  0xbe   : > { %946 = vmatpush2.bf16.msra.mxu1 %v2982_v0 }
  0xbf   : > { %947 = vmatprep.subr.bf16.mxu1 %v2983_v1 }
  0xc0   : > { %701 = vmatpush2.bf16.msra.mxu0 %v2940_v56 }
  0xc2   : > { %948 = vmatpush2.bf16.msra.mxu1 %v2985_v2 }
  0xc3   : > { %703 = vmatmul.mubr.bf16.vlgmr.msra.gmra.mxu0 %v2467_v58  ;;  %949 = vmatprep.subr.bf16.mxu1 %v2986_v3 }
  0xc6   : > { %950 = vmatpush2.bf16.msra.mxu1 %v2988_v4 }
 0x115   : > { %v966_v29 = vpop.permute.xlu0 %965 }
 0x183   : > { %v704_v13 = vpop.f32.mrf.mxu0 }
 0x184   : > { %v705_v14 = vadd.f32 %v704_v13, %v496_v11 }
 0x185   : > { %v706_v15 = vpop.f32.mrf.mxu0 }
 0x186   : > { %v707_v16 = vadd.f32 %v706_v15, %v500_v12  ;;  %v711_v17 = vmax.f32 %v705_v14, 0.0 }
 0x187   : > { %v708_v18 = vpop.f32.mrf.mxu0 }
 0x188   : > { %v712_v19 = vmax.f32 %v707_v16, 0.0  ;;  %v713_v22 = vpack.c.bf16 %v711_v17, %v711_v17 }
 0x189   : > { %v709_v20 = vpop.f32.mrf.mxu0 }
 0x18a   : > { %v714_v21 = vpack.c.bf16 %v712_v19, %v712_v19 }
 0x18c   : > { %951 = vmatprep.mubr.bf16.mxu1 %v714_v21 }
 0x18d   : > { %952 = vmatmul.mubr.bf16.vlgmr.msra.gmra.mxu1 %v713_v22 }
 0x24d   : > { %v953_v26 = vpop.f32.mrf.mxu1 }
 0x24e   : > { %v954_v27 = vadd.f32 %v953_v26, %v752_v24 }
 0x24f   : > { %v955_v28 = vpop.f32.mrf.mxu1 }
 0x250   : > { %v960_v30 = vmax.f32 %v954_v27, 0.0  ;;  %v956_v31 = vadd.f32 %v955_v28, %v756_v25 }
 0x251   : > { %v957_v32 = vpop.f32.mrf.mxu1 }
 0x252   : > { %v961_v33 = vmax.f32 %v956_v31, 0.0  ;;  %v968_v34 = vmul.f32 %v966_v29, %v960_v30 }
 0x253   : > { %v958_v35 = vpop.f32.mrf.mxu1 }
 0x254   : > { %v969_v36 = vmul.f32 %v966_v29, %v961_v33  ;;  %v972_v37 = vrot.slane %v968_v34, 2  ;;  %v978_v40 = vrot.slane %v968_v34, 4  ;;  %v984_v45 = vrot.slane %v968_v34, 6 }
 0x256   : > { %v973_v38 = vrot.slane %v969_v36, 2  ;;  %v976_v39 = vadd.f32 %v972_v37, %v968_v34  ;;  %v979_v42 = vrot.slane %v969_v36, 4  ;;  %v985_v46 = vrot.slane %v969_v36, 6 }
 0x258   : > { %v977_v41 = vadd.f32 %v973_v38, %v969_v36  ;;  %v982_v43 = vadd.f32 %v978_v40, %v976_v39 }
 0x25a   : > { %v983_v44 = vadd.f32 %v979_v42, %v977_v41  ;;  %v988_v47 = vadd.f32 %v984_v45, %v982_v43 }
 0x25c   : > { %v989_v48 = vadd.f32 %v985_v46, %v983_v44  ;;  %1008 = sbr.rel (%p2536_p9) target bundleno = 938 (0x3aa), region = 72 }
 0x25e   : > { %v992_v49 = vcombine.low %v988_v47, %v989_v48 }
 0x260   : > { %2535 = vst.sshfl [vmem:[%s1003_s22] sm:$0x33 pattern:$0x76325410] %v992_v49 }
 0x261   : > { %v2989_v50 = vld [vmem:[#allocation9 + $0x78] sm:$0xff]   ;;  %v2993_v54 = vld [vmem:[#allocation9 + $0x70] sm:$0xff]   ;;  %v2997_v58 = vld [vmem:[#allocation9 + $0x68] sm:$0xff]  }
 0x262   : > { %v2990_v51 = vld [vmem:[#allocation9 + $0x38] sm:$0xff]   ;;  %2666 = vmatprep.subr.bf16.mxu0 %v2989_v50  ;;  %v2994_v55 = vld [vmem:[#allocation9 + $0x30] sm:$0xff]   ;;  %v2998_v59 = vld [vmem:[#allocation9 + $0x28] sm:$0xff]  }
 0x263   : > { %v2991_v52 = vld [vmem:[#allocation9 + $0xf8] sm:$0xff]   ;;  %2667 = vmatpush3.bf16.msra.mxu0 %v2990_v51  ;;  %v2995_v56 = vld [vmem:[#allocation9 + $0xf0] sm:$0xff]   ;;  %v2999_v60 = vld [vmem:[#allocation9 + $0xe8] sm:$0xff]  }
 0x264   : > { %v2992_v53 = vld [vmem:[#allocation9 + $0xb8] sm:$0xff]   ;;  %2688 = vmatprep.subr.bf16.mxu1 %v2991_v52  ;;  %2668 = vmatprep.subr.bf16.mxu0 %v2993_v54  ;;  %v2996_v57 = vld [vmem:[#allocation9 + $0xb0] sm:$0xff]   ;;  %v3000_v61 = vld [vmem:[#allocation9 + $0xa8] sm:$0xff]  }
 0x265   : > { %2689 = vmatpush3.bf16.msra.mxu1 %v2992_v53  ;;  %v3001_v62 = vld [vmem:[#allocation9 + $0x60] sm:$0xff]   ;;  %v3005_v2 = vld [vmem:[#allocation9 + $0x58] sm:$0xff]   ;;  %v3009_v6 = vld [vmem:[#allocation9 + $0x50] sm:$0xff]  }
 0x266   : > { %2690 = vmatprep.subr.bf16.mxu1 %v2995_v56  ;;  %v3002_v63 = vld [vmem:[#allocation9 + $0x20] sm:$0xff]   ;;  %v3006_v3 = vld [vmem:[#allocation9 + $0x18] sm:$0xff]   ;;  %v3010_v7 = vld [vmem:[#allocation9 + $0x10] sm:$0xff]  }
 0x267   : > { %2669 = vmatpush3.bf16.msra.mxu0 %v2994_v55  ;;  %v3003_v0 = vld [vmem:[#allocation9 + $0xe0] sm:$0xff]   ;;  %v3007_v4 = vld [vmem:[#allocation9 + $0xd8] sm:$0xff]   ;;  %v3011_v8 = vld [vmem:[#allocation9 + $0xd0] sm:$0xff]  }
 0x268   : > { %2670 = vmatprep.subr.bf16.mxu0 %v2997_v58  ;;  %v3004_v1 = vld [vmem:[#allocation9 + $0xa0] sm:$0xff]   ;;  %v3008_v5 = vld [vmem:[#allocation9 + $0x98] sm:$0xff]   ;;  %v3012_v9 = vld [vmem:[#allocation9 + $0x90] sm:$0xff]  }
 0x269   : > { %2691 = vmatpush3.bf16.msra.mxu1 %v2996_v57  ;;  %v3013_v10 = vld [vmem:[#allocation9 + $0x48] sm:$0xff]   ;;  %v3017_v14 = vld [vmem:[#allocation9 + $0x40] sm:$0xff]   ;;  %v3021_v21 = vld [vmem:[#allocation9 + $0x178] sm:$0xff]  }
 0x26a   : > { %2692 = vmatprep.subr.bf16.mxu1 %v2999_v60  ;;  %v3014_v11 = vld [vmem:[#allocation9 + $0x8] sm:$0xff]   ;;  %v3018_v15 = vld [vmem:[#allocation9] sm:$0xff]   ;;  %v3022_v25 = vld [vmem:[#allocation9 + $0x138] sm:$0xff]  }
 0x26b   : > { %2671 = vmatpush3.bf16.msra.mxu0 %v2998_v59  ;;  %v3015_v12 = vld [vmem:[#allocation9 + $0xc8] sm:$0xff]   ;;  %v3019_v16 = vld [vmem:[#allocation9 + $0xc0] sm:$0xff]   ;;  %v3023_v27 = vld [vmem:[#allocation9 + $0x1f8] sm:$0xff]  }
 0x26c   : > { %2672 = vmatprep.subr.bf16.mxu0 %v3001_v62  ;;  %v3016_v13 = vld [vmem:[#allocation9 + $0x88] sm:$0xff]   ;;  %v2537_v17 = vld.sshfl [vmem:[#allocation2] sm:$0x33 pattern:$0x76325410]  ;;  %v3024_v29 = vld [vmem:[#allocation9 + $0x1b8] sm:$0xff]  }
 0x26d   : > { %2693 = vmatpush3.bf16.msra.mxu1 %v3000_v61  ;;  %v1030_v18 = vcombine.high %v2537_v17, %v2537_v17  ;;  %v3020_v19 = vld [vmem:[#allocation9 + $0x80] sm:$0xff]   ;;  %v1099_v20 = vpack.c.bf16 %v2537_v17, %v2537_v17  ;;  %v3025_v30 = vld [vmem:[#allocation9 + $0x170] sm:$0xff]   ;;  %v3029_v34 = vld [vmem:[#allocation9 + $0x168] sm:$0xff]  }
 0x26e   : > { %2694 = vmatprep.subr.bf16.mxu1 %v3003_v0  ;;  %v2538_v23 = vld.sshfl [vmem:[#allocation2 + $0x4] sm:$0x33 pattern:$0x76325410]  ;;  %v3026_v31 = vld [vmem:[#allocation9 + $0x130] sm:$0xff]   ;;  %v3030_v35 = vld [vmem:[#allocation9 + $0x128] sm:$0xff]  }
 0x26f   : > { %2673 = vmatpush3.bf16.msra.mxu0 %v3002_v63  ;;  %v1100_v22 = vpack.c.bf16 %v1030_v18, %v1030_v18  ;;  %v1041_v24 = vcombine.high %v2538_v23, %v2538_v23  ;;  %v1101_v26 = vpack.c.bf16 %v2538_v23, %v2538_v23  ;;  %v3027_v32 = vld [vmem:[#allocation9 + $0x1f0] sm:$0xff]   ;;  %v3031_v36 = vld [vmem:[#allocation9 + $0x1e8] sm:$0xff]   ;;  %v3033_v38 = vld [vmem:[#allocation9 + $0x160] sm:$0xff]  }
 0x270   : > { %2674 = vmatprep.subr.bf16.mxu0 %v3005_v2  ;;  %v3028_v33 = vld [vmem:[#allocation9 + $0x1b0] sm:$0xff]   ;;  %v3032_v37 = vld [vmem:[#allocation9 + $0x1a8] sm:$0xff]   ;;  %v3034_v39 = vld [vmem:[#allocation9 + $0x120] sm:$0xff]  }
 0x271   : > { %2695 = vmatpush3.bf16.msra.mxu1 %v3004_v1  ;;  %2048 = vmatprep.mubr.bf16.mxu0 %v1100_v22  ;;  %v1102_v28 = vpack.c.bf16 %v1041_v24, %v1041_v24  ;;  %v3035_v40 = vld [vmem:[#allocation9 + $0x1e0] sm:$0xff]   ;;  %v3037_v42 = vld [vmem:[#allocation9 + $0x158] sm:$0xff]   ;;  %v3041_v46 = vld [vmem:[#allocation9 + $0x150] sm:$0xff]  }
 0x272   : > { %2696 = vmatprep.subr.bf16.mxu1 %v3007_v4  ;;  %v3036_v41 = vld [vmem:[#allocation9 + $0x1a0] sm:$0xff]   ;;  %v3038_v43 = vld [vmem:[#allocation9 + $0x118] sm:$0xff]   ;;  %v3042_v47 = vld [vmem:[#allocation9 + $0x110] sm:$0xff]  }
 0x273   : > { %2675 = vmatpush3.bf16.msra.mxu0 %v3006_v3  ;;  %2088 = vmatprep.mubr.bf16.mxu1 %v1102_v28  ;;  %v3039_v44 = vld [vmem:[#allocation9 + $0x1d8] sm:$0xff]   ;;  %v3043_v48 = vld [vmem:[#allocation9 + $0x1d0] sm:$0xff]   ;;  %v3045_v50 = vld [vmem:[#allocation9 + $0x148] sm:$0xff]  }
 0x274   : > { %2676 = vmatprep.subr.bf16.mxu0 %v3009_v6  ;;  %v3040_v45 = vld [vmem:[#allocation9 + $0x198] sm:$0xff]   ;;  %v3044_v49 = vld [vmem:[#allocation9 + $0x190] sm:$0xff]   ;;  %v3046_v51 = vld [vmem:[#allocation9 + $0x108] sm:$0xff]  }
 0x275   : > { %2697 = vmatpush3.bf16.msra.mxu1 %v3008_v5  ;;  %v3047_v52 = vld [vmem:[#allocation9 + $0x1c8] sm:$0xff]   ;;  %v3049_v54 = vld [vmem:[#allocation9 + $0x140] sm:$0xff]   ;;  %v3053_v61 = vld [vmem:[#allocation9 + $0x278] sm:$0xff]  }
 0x276   : > { %2698 = vmatprep.subr.bf16.mxu1 %v3011_v8  ;;  %v3048_v53 = vld [vmem:[#allocation9 + $0x188] sm:$0xff]   ;;  %v3050_v55 = vld [vmem:[#allocation9 + $0x100] sm:$0xff]   ;;  %v3054_v1 = vld [vmem:[#allocation9 + $0x238] sm:$0xff]  }
 0x277   : > { %2677 = vmatpush3.bf16.msra.mxu0 %v3010_v7  ;;  %v3051_v56 = vld [vmem:[#allocation9 + $0x1c0] sm:$0xff]   ;;  %v2539_v57 = vld.sshfl [vmem:[#allocation2 + $0x8] sm:$0x33 pattern:$0x76325410]  ;;  %v3055_v3 = vld [vmem:[#allocation9 + $0x2f8] sm:$0xff]  }
 0x278   : > { %2678 = vmatprep.subr.bf16.mxu0 %v3013_v10  ;;  %v3052_v58 = vld [vmem:[#allocation9 + $0x180] sm:$0xff]   ;;  %v1052_v59 = vcombine.high %v2539_v57, %v2539_v57  ;;  %v1103_v60 = vpack.c.bf16 %v2539_v57, %v2539_v57  ;;  %v2540_v63 = vld.sshfl [vmem:[#allocation2 + $0xc] sm:$0x33 pattern:$0x76325410]  ;;  %v3056_v5 = vld [vmem:[#allocation9 + $0x2b8] sm:$0xff]  }
 0x279   : > { %2699 = vmatpush3.bf16.msra.mxu1 %v3012_v9  ;;  %v1063_v0 = vcombine.high %v2540_v63, %v2540_v63  ;;  %v1105_v2 = vpack.c.bf16 %v2540_v63, %v2540_v63  ;;  %v3057_v6 = vld [vmem:[#allocation9 + $0x270] sm:$0xff]   ;;  %v3061_v10 = vld [vmem:[#allocation9 + $0x268] sm:$0xff]   ;;  %v3068_v17 = vld [vmem:[#allocation9 + $0x2a0] sm:$0xff]  }
 0x27a   : > { %2700 = vmatprep.subr.bf16.mxu1 %v3015_v12  ;;  %v1104_v62 = vpack.c.bf16 %v1052_v59, %v1052_v59  ;;  %v3058_v7 = vld [vmem:[#allocation9 + $0x230] sm:$0xff]   ;;  %v3063_v12 = vld [vmem:[#allocation9 + $0x2e8] sm:$0xff]   ;;  %v3069_v18 = vld [vmem:[#allocation9 + $0x258] sm:$0xff]  }
 0x27b   : > { %2679 = vmatpush3.bf16.msra.mxu0 %v3014_v11  ;;  %v1106_v4 = vpack.c.bf16 %v1063_v0, %v1063_v0  ;;  %v3059_v8 = vld [vmem:[#allocation9 + $0x2f0] sm:$0xff]   ;;  %v3062_v11 = vld [vmem:[#allocation9 + $0x228] sm:$0xff]   ;;  %v3099_v59 = vld [vmem:[#allocation9 + $0x340] sm:$0xff]  }
 0x27c   : > { %2680 = vmatprep.subr.bf16.mxu0 %v3017_v14  ;;  %v3060_v9 = vld [vmem:[#allocation9 + $0x2b0] sm:$0xff]   ;;  %v3065_v14 = vld [vmem:[#allocation9 + $0x260] sm:$0xff]   ;;  %v3079_v28 = vld [vmem:[#allocation9 + $0x2c8] sm:$0xff]  }
 0x27d   : > { %2701 = vmatpush3.bf16.msra.mxu1 %v3016_v13  ;;  %v3064_v13 = vld [vmem:[#allocation9 + $0x2a8] sm:$0xff]   ;;  %v3073_v22 = vld [vmem:[#allocation9 + $0x250] sm:$0xff]   ;;  %v2544_v63 = vld [vmem:[%s3688_s9] ss:$0 sm:$0xff] }
 0x27e   : > { %2702 = vmatprep.subr.bf16.mxu1 %v3019_v16  ;;  %v3067_v16 = vld [vmem:[#allocation9 + $0x2e0] sm:$0xff]   ;;  %v3074_v23 = vld [vmem:[#allocation9 + $0x210] sm:$0xff]   ;;  %v3097_v57 = vld [vmem:[#allocation9 + $0x348] sm:$0xff]  }
 0x27f   : > { %2681 = vmatpush3.bf16.msra.mxu0 %v3018_v15  ;;  %v3066_v15 = vld [vmem:[#allocation9 + $0x220] sm:$0xff]   ;;  %v3075_v24 = vld [vmem:[#allocation9 + $0x2d0] sm:$0xff]  }
 0x280   : > { %2710 = vmatprep.subr.bf16.mxu0 %v3021_v21  ;;  %v3072_v21 = vld [vmem:[#allocation9 + $0x298] sm:$0xff]  }
 0x281   : > { %2703 = vmatpush3.bf16.msra.mxu1 %v3020_v19  ;;  %v3070_v19 = vld [vmem:[#allocation9 + $0x218] sm:$0xff]  }
 0x282   : > { %2049 = vmatmul.mubr.bf16.vlgmr.msra.gmra.mxu0 %v1099_v20  ;;  %2732 = vmatprep.subr.bf16.mxu1 %v3023_v27  ;;  %v3071_v20 = vld [vmem:[#allocation9 + $0x2d8] sm:$0xff]   ;;  %v3078_v27 = vld [vmem:[#allocation9 + $0x208] sm:$0xff]  }
 0x283   : > { %2711 = vmatpush3.bf16.msra.mxu0 %v3022_v25  ;;  %2128 = vmatprep.mubr.bf16.mxu0 %v1104_v62  ;;  %v3076_v25 = vld [vmem:[#allocation9 + $0x290] sm:$0xff]  }
 0x284   : > { %2089 = vmatmul.mubr.bf16.vlgmr.msra.gmra.mxu1 %v1101_v26  ;;  %2712 = vmatprep.subr.bf16.mxu0 %v3025_v30  ;;  %v3077_v26 = vld [vmem:[#allocation9 + $0x248] sm:$0xff]   ;;  %v3081_v30 = vld [vmem:[#allocation9 + $0x240] sm:$0xff]  }
 0x285   : > { %2733 = vmatpush3.bf16.msra.mxu1 %v3024_v29  ;;  %2168 = vmatprep.mubr.bf16.mxu1 %v1106_v4  ;;  %v3080_v29 = vld [vmem:[#allocation9 + $0x288] sm:$0xff]  }
 0x286   : > { %2734 = vmatprep.subr.bf16.mxu1 %v3027_v32  ;;  %v3083_v32 = vld [vmem:[#allocation9 + $0x2c0] sm:$0xff]  }
 0x287   : > { %2713 = vmatpush3.bf16.msra.mxu0 %v3026_v31  ;;  %v3082_v31 = vld [vmem:[#allocation9 + $0x200] sm:$0xff]  }
 0x288   : > { %2714 = vmatprep.subr.bf16.mxu0 %v3029_v34  ;;  %v3084_v34 = vld [vmem:[#allocation9 + $0x280] sm:$0xff]  }
 0x289   : > { %2735 = vmatpush3.bf16.msra.mxu1 %v3028_v33  ;;  %v2541_v33 = vld.sshfl [vmem:[#allocation2 + $0x10] sm:$0x33 pattern:$0x76325410] }
 0x28a   : > { %2736 = vmatprep.subr.bf16.mxu1 %v3031_v36  ;;  %v1107_v36 = vpack.c.bf16 %v2541_v33, %v2541_v33 }
 0x28b   : > { %2715 = vmatpush3.bf16.msra.mxu0 %v3030_v35  ;;  %v1074_v35 = vcombine.high %v2541_v33, %v2541_v33 }
 0x28c   : > { %2716 = vmatprep.subr.bf16.mxu0 %v3033_v38 }
 0x28d   : > { %2737 = vmatpush3.bf16.msra.mxu1 %v3032_v37  ;;  %v3085_v37 = vld [vmem:[#allocation9 + $0x378] sm:$0xff]   ;;  %v1108_v38 = vpack.c.bf16 %v1074_v35, %v1074_v35 }
 0x28e   : > { %2738 = vmatprep.subr.bf16.mxu1 %v3035_v40 }
 0x28f   : > { %2717 = vmatpush3.bf16.msra.mxu0 %v3034_v39  ;;  %v2542_v39 = vld.sshfl [vmem:[#allocation2 + $0x14] sm:$0x33 pattern:$0x76325410] }
 0x290   : > { %2718 = vmatprep.subr.bf16.mxu0 %v3037_v42  ;;  %v1085_v40 = vcombine.high %v2542_v39, %v2542_v39  ;;  %v1109_v42 = vpack.c.bf16 %v2542_v39, %v2542_v39 }
 0x291   : > { %2739 = vmatpush3.bf16.msra.mxu1 %v3036_v41  ;;  %v3086_v41 = vld [vmem:[#allocation9 + $0x338] sm:$0xff]  }
 0x292   : > { %2740 = vmatprep.subr.bf16.mxu1 %v3039_v44  ;;  %v1110_v44 = vpack.c.bf16 %v1085_v40, %v1085_v40 }
 0x293   : > { %2719 = vmatpush3.bf16.msra.mxu0 %v3038_v43  ;;  %v3087_v43 = vld [vmem:[#allocation9 + $0x370] sm:$0xff]  }
 0x294   : > { %2720 = vmatprep.subr.bf16.mxu0 %v3041_v46  ;;  %v3089_v46 = vld [vmem:[#allocation9 + $0x368] sm:$0xff]  }
 0x295   : > { %2741 = vmatpush3.bf16.msra.mxu1 %v3040_v45  ;;  %v3088_v45 = vld [vmem:[#allocation9 + $0x330] sm:$0xff]  }
 0x296   : > { %2742 = vmatprep.subr.bf16.mxu1 %v3043_v48  ;;  %v3091_v48 = vld [vmem:[#allocation9 + $0x360] sm:$0xff]  }
 0x297   : > { %2721 = vmatpush3.bf16.msra.mxu0 %v3042_v47  ;;  %v3090_v47 = vld [vmem:[#allocation9 + $0x328] sm:$0xff]  }
 0x298   : > { %2722 = vmatprep.subr.bf16.mxu0 %v3045_v50  ;;  %v3093_v50 = vld [vmem:[#allocation9 + $0x358] sm:$0xff]  }
 0x299   : > { %2743 = vmatpush3.bf16.msra.mxu1 %v3044_v49  ;;  %v3092_v49 = vld [vmem:[#allocation9 + $0x320] sm:$0xff]  }
 0x29a   : > { %2744 = vmatprep.subr.bf16.mxu1 %v3047_v52  ;;  %v3094_v52 = vld [vmem:[#allocation9 + $0x318] sm:$0xff]  }
 0x29b   : > { %2723 = vmatpush3.bf16.msra.mxu0 %v3046_v51  ;;  %v2543_v51 = vld.sshfl [vmem:[#allocation2 + $0x18] sm:$0x33 pattern:$0x76325410] }
 0x29c   : > { %2724 = vmatprep.subr.bf16.mxu0 %v3049_v54  ;;  %v3095_v54 = vld [vmem:[#allocation9 + $0x350] sm:$0xff]  }
 0x29d   : > { %2745 = vmatpush3.bf16.msra.mxu1 %v3048_v53  ;;  %v1096_v53 = vcombine.high %v2543_v51, %v2543_v51 }
 0x29e   : > { %2746 = vmatprep.subr.bf16.mxu1 %v3051_v56  ;;  %v3096_v56 = vld [vmem:[#allocation9 + $0x310] sm:$0xff]  }
 0x29f   : > { %2725 = vmatpush3.bf16.msra.mxu0 %v3050_v55  ;;  %v1112_v55 = vpack.c.bf16 %v1096_v53, %v1096_v53 }
 0x2a0   : > { %2754 = vmatprep.subr.bf16.mxu0 %v3053_v61  ;;  %v1111_v61 = vpack.c.bf16 %v2543_v51, %v2543_v51 }
 0x2a1   : > { %2747 = vmatpush3.bf16.msra.mxu1 %v3052_v58  ;;  %v3098_v58 = vld [vmem:[#allocation9 + $0x308] sm:$0xff]  }
 0x2a2   : > { %2129 = vmatmul.mubr.bf16.vlgmr.msra.gmra.mxu0 %v1103_v60  ;;  %2776 = vmatprep.subr.bf16.mxu1 %v3055_v3  ;;  %v3100_v60 = vld [vmem:[#allocation9 + $0x300] sm:$0xff]  }
 0x2a3   : > { %2755 = vmatpush3.bf16.msra.mxu0 %v3054_v1  ;;  %2208 = vmatprep.mubr.bf16.mxu0 %v1108_v38 }
 0x2a4   : > { %2169 = vmatmul.mubr.bf16.vlgmr.msra.gmra.mxu1 %v1105_v2  ;;  %2756 = vmatprep.subr.bf16.mxu0 %v3057_v6 }
 0x2a5   : > { %2777 = vmatpush3.bf16.msra.mxu1 %v3056_v5  ;;  %2248 = vmatprep.mubr.bf16.mxu1 %v1110_v44 }
 0x2a6   : > { %2778 = vmatprep.subr.bf16.mxu1 %v3059_v8 }
 0x2a7   : > { %2757 = vmatpush3.bf16.msra.mxu0 %v3058_v7 }
 0x2a8   : > { %2758 = vmatprep.subr.bf16.mxu0 %v3061_v10 }
 0x2a9   : > { %2779 = vmatpush3.bf16.msra.mxu1 %v3060_v9 }
 0x2aa   : > { %2780 = vmatprep.subr.bf16.mxu1 %v3063_v12 }
 0x2ab   : > { %2759 = vmatpush3.bf16.msra.mxu0 %v3062_v11 }
 0x2ac   : > { %2760 = vmatprep.subr.bf16.mxu0 %v3065_v14 }
 0x2ad   : > { %2781 = vmatpush3.bf16.msra.mxu1 %v3064_v13 }
 0x2ae   : > { %2782 = vmatprep.subr.bf16.mxu1 %v3067_v16 }
 0x2af   : > { %2761 = vmatpush3.bf16.msra.mxu0 %v3066_v15 }
 0x2b0   : > { %2762 = vmatprep.subr.bf16.mxu0 %v3069_v18 }
 0x2b1   : > { %2783 = vmatpush3.bf16.msra.mxu1 %v3068_v17 }
 0x2b2   : > { %2784 = vmatprep.subr.bf16.mxu1 %v3071_v20 }
 0x2b3   : > { %2763 = vmatpush3.bf16.msra.mxu0 %v3070_v19 }
 0x2b4   : > { %2764 = vmatprep.subr.bf16.mxu0 %v3073_v22 }
 0x2b5   : > { %2785 = vmatpush3.bf16.msra.mxu1 %v3072_v21 }
 0x2b6   : > { %2786 = vmatprep.subr.bf16.mxu1 %v3075_v24 }
 0x2b7   : > { %2765 = vmatpush3.bf16.msra.mxu0 %v3074_v23 }
 0x2b8   : > { %2766 = vmatprep.subr.bf16.mxu0 %v3077_v26 }
 0x2b9   : > { %2787 = vmatpush3.bf16.msra.mxu1 %v3076_v25 }
 0x2ba   : > { %2788 = vmatprep.subr.bf16.mxu1 %v3079_v28 }
 0x2bb   : > { %2767 = vmatpush3.bf16.msra.mxu0 %v3078_v27 }
 0x2bc   : > { %2768 = vmatprep.subr.bf16.mxu0 %v3081_v30 }
 0x2bd   : > { %2789 = vmatpush3.bf16.msra.mxu1 %v3080_v29 }
 0x2be   : > { %2790 = vmatprep.subr.bf16.mxu1 %v3083_v32 }
 0x2bf   : > { %2769 = vmatpush3.bf16.msra.mxu0 %v3082_v31 }
 0x2c0   : > { %2798 = vmatprep.subr.bf16.mxu0 %v3085_v37 }
 0x2c1   : > { %2791 = vmatpush3.bf16.msra.mxu1 %v3084_v34 }
 0x2c2   : > { %2209 = vmatmul.mubr.bf16.vlgmr.msra.gmra.mxu0 %v1107_v36 }
 0x2c3   : > { %2799 = vmatpush3.bf16.msra.mxu0 %v3086_v41  ;;  %2288 = vmatprep.mubr.bf16.mxu0 %v1112_v55 }
 0x2c4   : > { %2800 = vmatprep.subr.bf16.mxu0 %v3087_v43  ;;  %2249 = vmatmul.mubr.bf16.vlgmr.msra.gmra.mxu1 %v1109_v42 }
 0x2c7   : > { %2801 = vmatpush3.bf16.msra.mxu0 %v3088_v45 }
 0x2c8   : > { %2802 = vmatprep.subr.bf16.mxu0 %v3089_v46 }
 0x2cb   : > { %2803 = vmatpush3.bf16.msra.mxu0 %v3090_v47 }
 0x2cc   : > { %2804 = vmatprep.subr.bf16.mxu0 %v3091_v48 }
 0x2cf   : > { %2805 = vmatpush3.bf16.msra.mxu0 %v3092_v49 }
 0x2d0   : > { %2806 = vmatprep.subr.bf16.mxu0 %v3093_v50 }
 0x2d3   : > { %2807 = vmatpush3.bf16.msra.mxu0 %v3094_v52 }
 0x2d4   : > { %2808 = vmatprep.subr.bf16.mxu0 %v3095_v54 }
 0x2d7   : > { %2809 = vmatpush3.bf16.msra.mxu0 %v3096_v56 }
 0x2d8   : > { %2810 = vmatprep.subr.bf16.mxu0 %v3097_v57 }
 0x2db   : > { %2811 = vmatpush3.bf16.msra.mxu0 %v3098_v58 }
 0x2dc   : > { %2812 = vmatprep.subr.bf16.mxu0 %v3099_v59 }
 0x2df   : > { %2813 = vmatpush3.bf16.msra.mxu0 %v3100_v60 }
 0x2e2   : > { %2289 = vmatmul.mubr.bf16.vlgmr.msra.gmra.mxu0 %v1111_v61 }
 0x342   : > { %v2682_v62 = vpop.f32.mrf.mxu0 }
 0x344   : > { %v2683_v0 = vpop.f32.mrf.mxu0  ;;  %v2704_v2 = vpop.f32.mrf.mxu1 }
 0x345   : > { %v2684_v1 = vadd.f32 %v2683_v0, %v2682_v62 }
 0x346   : > { %v2685_v3 = vpop.f32.mrf.mxu0  ;;  %v2705_v5 = vpop.f32.mrf.mxu1 }
 0x347   : > { %v2051_v4 = vadd.f32 %v2684_v1, %v2544_v63  ;;  %v2706_v6 = vadd.f32 %v2705_v5, %v2704_v2 }
 0x348   : > { %v2686_v7 = vpop.f32.mrf.mxu0  ;;  %v2707_v8 = vpop.f32.mrf.mxu1 }
 0x349   : > { %v2091_v9 = vadd.f32 %v2706_v6, %v2051_v4 }
 0x34a   : > { %v2708_v10 = vpop.f32.mrf.mxu1 }
 0x362   : > { %v2726_v11 = vpop.f32.mrf.mxu0 }
 0x364   : > { %v2727_v12 = vpop.f32.mrf.mxu0  ;;  %v2748_v13 = vpop.f32.mrf.mxu1 }
 0x365   : > { %v2728_v27 = vadd.f32 %v2727_v12, %v2726_v11 }
 0x366   : > { %v2729_v14 = vpop.f32.mrf.mxu0  ;;  %v2749_v15 = vpop.f32.mrf.mxu1 }
 0x367   : > { %v2131_v28 = vadd.f32 %v2728_v27, %v2091_v9  ;;  %v2750_v29 = vadd.f32 %v2749_v15, %v2748_v13 }
 0x368   : > { %v2730_v16 = vpop.f32.mrf.mxu0  ;;  %v2751_v17 = vpop.f32.mrf.mxu1 }
 0x369   : > { %v2171_v31 = vadd.f32 %v2750_v29, %v2131_v28 }
 0x36a   : > { %v2752_v18 = vpop.f32.mrf.mxu1 }
 0x382   : > { %v2770_v19 = vpop.f32.mrf.mxu0 }
 0x384   : > { %v2771_v20 = vpop.f32.mrf.mxu0  ;;  %v2792_v21 = vpop.f32.mrf.mxu1 }
 0x385   : > { %v2772_v30 = vadd.f32 %v2771_v20, %v2770_v19 }
 0x386   : > { %v2773_v22 = vpop.f32.mrf.mxu0  ;;  %v2793_v23 = vpop.f32.mrf.mxu1 }
 0x387   : > { %v2211_v32 = vadd.f32 %v2772_v30, %v2171_v31  ;;  %v2794_v33 = vadd.f32 %v2793_v23, %v2792_v21 }
 0x388   : > { %v2774_v24 = vpop.f32.mrf.mxu0  ;;  %v2795_v25 = vpop.f32.mrf.mxu1 }
 0x389   : > { %v2251_v36 = vadd.f32 %v2794_v33, %v2211_v32 }
 0x38a   : > { %v2796_v26 = vpop.f32.mrf.mxu1 }
 0x3a2   : > { %v2814_v34 = vpop.f32.mrf.mxu0 }
 0x3a4   : > { %v2815_v35 = vpop.f32.mrf.mxu0 }
 0x3a5   : > { %v2816_v37 = vadd.f32 %v2815_v35, %v2814_v34 }
 0x3a6   : > { %v2817_v38 = vpop.f32.mrf.mxu0 }
 0x3a7   : > { %v2291_v39 = vadd.f32 %v2816_v37, %v2251_v36 }
 0x3a8   : > { %v2818_v40 = vpop.f32.mrf.mxu0 }
 0x3a9   : > { %2296 = vst [vmem:[#allocation11] sm:$0x3] %v2291_v39 }
 0x3aa PF: > { %p2851_p11 = scmp.eq.s32.totalorder %s3417_s14, 6  ;;  %s3292_s19 = smov [#allocation11]  }
 0x3ab   : > { %s2304_s16 = sshll.u32 %s3292_s19, 4  ;;  %s2305_s16 = int_to_ptr.vmem [resolvable:$true] %s2304_s16 }
 0x3ac   : > { %s3211_s15 = scalar_lea.vmem %s2305_s16, 32  ;;  %p3218_p3 = scmp.lt.s32.totalorder %s2305_s16, %s2305_s16 }
 0x3ad   : > { %p3212_p12 = scmp.ne.s32.totalorder %s2305_s16, %s3211_s15  ;;  %p3219_p4 = scmp.lt.s32.totalorder %s3211_s15, %s3211_s15 }
 0x3af   : > { %p3213_p2 = pnand %p3212_p12, %p2851_p11  ;;  %p3220_p10 = por %p3219_p4, %p3218_p3 }
 0x3b1   : > { %p3214_p1 = pneg %p3213_p2 }
 0x3b3   : > { %p3221_p13 = pnand %p3220_p10, %p3214_p1 }
 0x3b5   : > { %3224 = shalt.err (!%p3221_p13)
}
 0x3b6   : > { %s3689_s23 = sld [smem:[#allocation21_spill]] }
 0x3bc   : > { %2831 = dma.vmem_to_hbm [thread:$0]  (%p2851_p11), %s2305_s16, 32, %s3689_s23, [#allocation5]  }
 0x3bd   : > { %3264 = dma.done.wait (%p2851_p11), [#allocation5], 32  }
 0x3be   : > { %3266 = vsyncadd (%p2851_p11), [#allocation5], 4294967264 }
 0x3bf PF: > { %s3690_s30 = sld [smem:[#allocation17_spill]]  ;;  %s3693_s27 = smov %s3273_s28 }
 0x3c0   : > { %s3691_s21 = sld [smem:[#allocation16_spill]] }
 0x3c1   : > { %s3692_s29 = sld [smem:[#allocation18_spill]] }
 0x3c5   : > { %p23_p7 = scmp.ge.s32.totalorder %s3690_s30, 9  }
 0x3c6   : > { %s3694_s28 = smov %s3691_s21 }
 0x3c7   :  { %25 = sbr.rel (!%p23_p7) target bundleno = 11 (0xb), region = 137 }
 0x3cc   :  { %2317 = vsyncpa [#allocation4], 1 }
 0x3cd   :  { %2319 = vsyncpa [#allocation4 + $0x1], 1 }
 0x3ce   :  { %2320 = vsyncpa [#allocation7], 1 }
 0x3cf   :  { %2322 = vsyncpa [#allocation7 + $0x1], 1 }
 0x3d0   :  { %2323 = vsyncpa [#allocation10], 1 }
 0x3d1   :  { %2324 = vsyncpa [#allocation5], 1 }
 0x3d2   :  { %2326 = vsyncpa [#allocation5 + $0x1], 1 }

</bundles_post_ra>
